<compile_context>
chip_gen: v7x
topology: tpu7x:2x2x1
jax: 0.10.0
libtpu: 0.0.40
codegen_flags: <defaults>
</compile_context>

<pallas_src>
import jax
import jax.numpy as jnp
from jax.experimental import pallas as pl
from jax.experimental.pallas import tpu as pltpu


def groupnet_kernel(x_ref, w1_ref, b1_ref, w2_ref, b2_ref, o_ref):
    # fc1 (MXU, f32 accumulate) + bias + relu.
    h = jnp.dot(x_ref[...], w1_ref[...], preferred_element_type=jnp.float32)
    h = jnp.maximum(h + b1_ref[...].astype(jnp.float32), 0.0)

    # fc3 — cast the f32 activation to the weight dtype only for the MXU operand
    # (a no-op for f32 weights); accumulation stays f32.
    z = jnp.dot(h.astype(w2_ref.dtype), w2_ref[...],
                preferred_element_type=jnp.float32)
    z = z + b2_ref[...].astype(jnp.float32)

    # Numerically stable softmax over dim=1 (the lane axis), all in f32.
    z = z - jnp.max(z, axis=-1, keepdims=True)
    e = jnp.exp(z)                                              # EUP
    inv = pl.reciprocal(jnp.sum(e, axis=-1, keepdims=True), approx=True)  # EUP
    o_ref[...] = (e * inv).astype(o_ref.dtype)


def groupnet_forward(x, w1, b1, w2, b2, *, block_m=2048):
    """GroupNet forward. Tiles the batch dim; parameters stay resident in VMEM."""
    batch, in_dim = x.shape
    hidden = w1.shape[1]
    out_dim = w2.shape[1]

    # Sublane-aligned row tile, no larger than the (rounded-up) batch.
    tm = min(block_m, max(batch, 8))
    tm = -(-tm // 8) * 8                       # round up to a multiple of 8
    padded = -(-batch // tm) * tm              # pad batch up to a tile multiple
    if padded != batch:
        x = jnp.pad(x, ((0, padded - batch), (0, 0)))

    grid = (padded // tm,)

    out = pl.pallas_call(
        groupnet_kernel,
        out_shape=jax.ShapeDtypeStruct((padded, out_dim), jnp.float32),
        grid_spec=pltpu.PrefetchScalarGridSpec(
            num_scalar_prefetch=0,
            grid=grid,
            in_specs=[
                # x tile: pipelined / double-buffered across the batch grid.
                pl.BlockSpec((tm, in_dim), lambda i: (i, 0)),
                # Parameters: constant index_map -> fetched once, VMEM-resident.
                pl.BlockSpec((in_dim, hidden), lambda i: (0, 0)),
                pl.BlockSpec((1, hidden), lambda i: (0, 0)),
                pl.BlockSpec((hidden, out_dim), lambda i: (0, 0)),
                pl.BlockSpec((1, out_dim), lambda i: (0, 0)),
            ],
            out_specs=pl.BlockSpec((tm, out_dim), lambda i: (i, 0)),
        ),
        compiler_params=pltpu.CompilerParams(
            # Independent batch tiles: lets a 2-TC chip shard the grid.
            dimension_semantics=("parallel",),
        ),
    )(x, w1, b1, w2, b2)
    return out[:batch]


def groupnet_reference(x, w1, b1, w2, b2):
    h = jnp.maximum(x @ w1 + b1, 0.0)
    z = h @ w2 + b2
    return jax.nn.softmax(z, axis=1)


if __name__ == "__main__":
    # Shapes implied by the module: x is [batch, input_dim]; hidden = 2*output_dim.
    batch, input_dim, output_dim = 64, 32, 16
    hidden = output_dim * 2

    key = jax.random.PRNGKey(0)
    kx, k1, kb1, k2, kb2 = jax.random.split(key, 5)

    x = jax.random.normal(kx, (batch, input_dim), dtype=jnp.float32)

    # Deterministic PyTorch-Linear-style init: U(-1/sqrt(fan_in), 1/sqrt(fan_in)),
    # weights stored pre-transposed as [in_features, out_features].
    bound1 = 1.0 / jnp.sqrt(jnp.float32(input_dim))
    w1 = jax.random.uniform(k1, (input_dim, hidden), jnp.float32, -bound1, bound1)
    b1 = jax.random.uniform(kb1, (1, hidden), jnp.float32, -bound1, bound1)

    bound2 = 1.0 / jnp.sqrt(jnp.float32(hidden))
    w2 = jax.random.uniform(k2, (hidden, output_dim), jnp.float32, -bound2, bound2)
    b2 = jax.random.uniform(kb2, (1, output_dim), jnp.float32, -bound2, bound2)

    # block_m=32 -> 2 grid steps at this small demo batch, exercising the
    # pipelined multi-step path; production callers keep the larger default.
    out = groupnet_forward(x, w1, b1, w2, b2, block_m=32)
    jax.block_until_ready(out)

    ref = groupnet_reference(x, w1, b1, w2, b2)
    assert out.shape == (batch, output_dim)
    # Tolerance relaxed slightly for the EUP approximate reciprocal in the
    # softmax normalization (values are in [0, 1]).
    assert jnp.max(jnp.abs(out - ref)) < 5e-3, "mismatch vs reference"
    assert jnp.max(jnp.abs(jnp.sum(out, axis=1) - 1.0)) < 5e-3, "softmax rows != 1"

    print("KERNEL_OK")
</pallas_src>

<mosaic_0001>
module attributes {stable_mosaic.version = 11 : i64} {
  func.func @groupnet_kernel(%arg0: i32, %arg1: memref<32x32xf32, #tpu.memory_space<vmem>>, %arg2: memref<32x32xf32, #tpu.memory_space<vmem>>, %arg3: memref<1x32xf32, #tpu.memory_space<vmem>>, %arg4: memref<32x16xf32, #tpu.memory_space<vmem>>, %arg5: memref<1x16xf32, #tpu.memory_space<vmem>>, %arg6: memref<32x16xf32, #tpu.memory_space<vmem>>) attributes {dimension_semantics = [#tpu.dimension_semantics<parallel>], iteration_bounds = array<i64: 2>, scalar_prefetch = 0 : i64, scratch_operands = 0 : i64, tpu.core_type = #tpu.core_type<tc>, window_params = [{transform_indices = @transform_0, window_bounds = array<i64: 32, 32>}, {pipeline_mode = #tpu.pipeline_mode<synchronous>, transform_indices = @transform_1, window_bounds = array<i64: 32, 32>}, {pipeline_mode = #tpu.pipeline_mode<synchronous>, transform_indices = @transform_2, window_bounds = array<i64: 1, 32>}, {pipeline_mode = #tpu.pipeline_mode<synchronous>, transform_indices = @transform_3, window_bounds = array<i64: 32, 16>}, {pipeline_mode = #tpu.pipeline_mode<synchronous>, transform_indices = @transform_4, window_bounds = array<i64: 1, 16>}, {transform_indices = @transform_5, window_bounds = array<i64: 32, 16>}]} {
    %c0 = arith.constant 0 : index
    %c0_0 = arith.constant 0 : index
    %0 = vector.load %arg1[%c0, %c0_0] : memref<32x32xf32, #tpu.memory_space<vmem>>, vector<32x32xf32>
    %c0_1 = arith.constant 0 : index
    %c0_2 = arith.constant 0 : index
    %1 = vector.load %arg2[%c0_1, %c0_2] : memref<32x32xf32, #tpu.memory_space<vmem>>, vector<32x32xf32>
    %cst = arith.constant dense<0.000000e+00> : vector<32x32xf32>
    %2 = tpu.matmul %0, %1, %cst {dimension_numbers = #tpu.dot_dimension_numbers<[1], [0], [0], [1], [0, 0, 1, 1], [], []>} : vector<32x32xf32>, vector<32x32xf32>, vector<32x32xf32> -> vector<32x32xf32>
    %c0_3 = arith.constant 0 : index
    %c0_4 = arith.constant 0 : index
    %3 = vector.load %arg3[%c0_3, %c0_4] : memref<1x32xf32, #tpu.memory_space<vmem>>, vector<1x32xf32>
    %4 = vector.broadcast %3 : vector<1x32xf32> to vector<32x32xf32>
    %5 = arith.addf %2, %4 : vector<32x32xf32>
    %cst_5 = arith.constant 0.000000e+00 : f32
    %6 = vector.broadcast %cst_5 : f32 to vector<32x32xf32>
    %7 = arith.maximumf %5, %6 : vector<32x32xf32>
    %c0_6 = arith.constant 0 : index
    %c0_7 = arith.constant 0 : index
    %8 = vector.load %arg4[%c0_6, %c0_7] : memref<32x16xf32, #tpu.memory_space<vmem>>, vector<32x16xf32>
    %cst_8 = arith.constant dense<0.000000e+00> : vector<32x16xf32>
    %9 = tpu.matmul %7, %8, %cst_8 {dimension_numbers = #tpu.dot_dimension_numbers<[1], [0], [0], [1], [0, 0, 1, 1], [], []>} : vector<32x32xf32>, vector<32x16xf32>, vector<32x16xf32> -> vector<32x16xf32>
    %c0_9 = arith.constant 0 : index
    %c0_10 = arith.constant 0 : index
    %10 = vector.load %arg5[%c0_9, %c0_10] : memref<1x16xf32, #tpu.memory_space<vmem>>, vector<1x16xf32>
    %11 = vector.broadcast %10 : vector<1x16xf32> to vector<32x16xf32>
    %12 = arith.addf %9, %11 : vector<32x16xf32>
    %cst_11 = arith.constant dense<0xFF800000> : vector<32xf32>
    %13 = vector.multi_reduction <maximumf>, %12, %cst_11 [1] : vector<32x16xf32> to vector<32xf32>
    %14 = vector.shape_cast %13 : vector<32xf32> to vector<32x1xf32>
    %15 = vector.broadcast %14 : vector<32x1xf32> to vector<32x16xf32>
    %16 = arith.subf %12, %15 : vector<32x16xf32>
    %17 = math.exp %16 : vector<32x16xf32>
    %cst_12 = arith.constant dense<0.000000e+00> : vector<32xf32>
    %18 = vector.multi_reduction <add>, %17, %cst_12 [1] : vector<32x16xf32> to vector<32xf32>
    %19 = vector.shape_cast %18 : vector<32xf32> to vector<32x1xf32>
    %20 = tpu.reciprocal %19 {approx = true} : vector<32x1xf32> -> vector<32x1xf32>
    %21 = vector.broadcast %20 : vector<32x1xf32> to vector<32x16xf32>
    %22 = arith.mulf %17, %21 : vector<32x16xf32>
    %c0_13 = arith.constant 0 : index
    %c0_14 = arith.constant 0 : index
    %23 = vector.load %arg6[%c0_13, %c0_14] : memref<32x16xf32, #tpu.memory_space<vmem>>, vector<32x16xf32>
    tpu.vector_store %arg6[%c0_13, %c0_14], %22 {strides = array<i32>} : memref<32x16xf32, #tpu.memory_space<vmem>>, vector<32x16xf32>,
    return
  }
  func.func @transform_0(%arg0: i32) -> (i32, i32) {
    %c0_i32 = arith.constant 0 : i32
    %c0_i32_0 = arith.constant 0 : i32
    return %arg0, %c0_i32 : i32, i32
  }
  func.func @transform_1(%arg0: i32) -> (i32, i32) {
    %c0_i32 = arith.constant 0 : i32
    %c0_i32_0 = arith.constant 0 : i32
    %c0_i32_1 = arith.constant 0 : i32
    return %c0_i32, %c0_i32_0 : i32, i32
  }
  func.func @transform_2(%arg0: i32) -> (i32, i32) {
    %c0_i32 = arith.constant 0 : i32
    %c0_i32_0 = arith.constant 0 : i32
    %c0_i32_1 = arith.constant 0 : i32
    return %c0_i32, %c0_i32_0 : i32, i32
  }
  func.func @transform_3(%arg0: i32) -> (i32, i32) {
    %c0_i32 = arith.constant 0 : i32
    %c0_i32_0 = arith.constant 0 : i32
    %c0_i32_1 = arith.constant 0 : i32
    return %c0_i32, %c0_i32_0 : i32, i32
  }
  func.func @transform_4(%arg0: i32) -> (i32, i32) {
    %c0_i32 = arith.constant 0 : i32
    %c0_i32_0 = arith.constant 0 : i32
    %c0_i32_1 = arith.constant 0 : i32
    return %c0_i32, %c0_i32_0 : i32, i32
  }
  func.func @transform_5(%arg0: i32) -> (i32, i32) {
    %c0_i32 = arith.constant 0 : i32
    %c0_i32_0 = arith.constant 0 : i32
    return %arg0, %c0_i32 : i32, i32
  }
}

</mosaic_0001>

<bundles_post_ra>
// kernel: tpu_custom_call.1
= control target key start
LH: loop header
LB: loop body
LE: loop exit
PB: predicated region body
PF: predicated region fallthrough
CT: control target
= control target key end

     0   :  { %s701_s18 = smov 0   ;;  %s775_s0 = inlined_call_operand.vmem [shape: f32[64,32], index: 0, kind: input, shape index: {}]   ;;  %s776_s1 = inlined_call_operand.vmem [shape: f32[32,32], index: 1, kind: input, shape index: {}]   ;;  %s777_s2 = inlined_call_operand.vmem [shape: f32[1,32], index: 2, kind: input, shape index: {}]   ;;  %s778_s3 = inlined_call_operand.vmem [shape: f32[32,16], index: 3, kind: input, shape index: {}]   ;;  %s779_s4 = inlined_call_operand.vmem [shape: f32[1,16], index: 4, kind: input, shape index: {}]   ;;  %s780_s5 = inlined_call_operand.vmem [shape: f32[64,16], index: 5, kind: output, shape index: {}]  }
   0x1 LB: > { %s558_s19 = sadd.s32 4294967295, %s669_s18   ;;  %p562_p0 = scmp.ge.s32.totalorder %s669_s18, 1  ;;  %s669_s18 = sphi %s701_s18, %s15_s18  }
   0x2   : > { %p188_p1 = scmp.lt.s32.totalorder %s669_s18, 3 }
   0x4   : > { %p189_p2 = pnand %p562_p0, %p188_p1 }
   0x5   : > { %v232_v0 = vld [vmem:[%s776_s1] sm:$0xff] (!%p189_p2)  ;;  %v233_v1 = vld [vmem:[%s776_s1 + $0x8] sm:$0xff] (!%p189_p2)  ;;  %v234_v2 = vld [vmem:[%s776_s1 + $0x10] sm:$0xff] (!%p189_p2)  ;;  %s563_s26 = sshll.u32 (!%p189_p2), %s558_s19, 2  ;;  %vm243_vm0 = vcmask (!%p189_p2), 261120   ;;  %vm453_vm1 = vcmask (!%p189_p2), 130048  }
   0x6   : > { %192 = sbr.rel (%p189_p2) target bundleno = 775 (0x307), region = 40  ;;  %v623_v3 = vpack.c.bf16 (!%p189_p2), %v233_v1, %v232_v0  ;;  %v235_v4 = vld [vmem:[%s776_s1 + $0x18] sm:$0xff] (!%p189_p2)  ;;  %p217_p3 = scmp.lt.s32.totalorder (!%p189_p2), %s563_s26, 7  ;;  %v345_v5 = vld [vmem:[%s778_s3] sm:$0xff] (!%p189_p2)  ;;  %v346_v6 = vld [vmem:[%s778_s3 + $0x8] sm:$0xff] (!%p189_p2) }
   0x7   : > { %v627_v7 = vpack.c.bf16 (!%p189_p2), %v235_v4, %v234_v2  ;;  %v631_v8 = vpack.c.bf16 (!%p189_p2), %v346_v6, %v345_v5  ;;  %v347_v13 = vld [vmem:[%s778_s3 + $0x10] sm:$0xff] (!%p189_p2)  ;;  %v348_v14 = vld [vmem:[%s778_s3 + $0x18] sm:$0xff] (!%p189_p2)  ;;  %v567_v16 = vld [vmem:[%s777_s2] ss:$0 sm:$0xff] (!%p189_p2) }
   0x8   : > { %624 = vmatprep.subr.bf16.mxu0 (!%p189_p2), %v623_v3  ;;  %v635_v15 = vpack.c.bf16 (!%p189_p2), %v348_v14, %v347_v13  ;;  %v572_v29 = vld [vmem:[%s779_s4] ss:$0 sm:$0xff] (!%p189_p2) }
   0x9   : > { %626 = vmatpush3.bf16.msra.mxu0 (!%p189_p2), %v623_v3  ;;  %632 = vmatprep.subr.bf16.mxu1 (!%p189_p2), %v631_v8 }
   0xa   : > { %628 = vmatprep.subr.bf16.mxu0 (!%p189_p2), %v627_v7  ;;  %634 = vmatpush3.bf16.msra.mxu1 (!%p189_p2), %v631_v8 }
   0xb   : > { %636 = vmatprep.subr.bf16.mxu1 (!%p189_p2), %v635_v15 }
   0xd   : > { %s782_s26 = smov (!%p217_p3, %s563_s26), 7  ;;  %630 = vmatpush3.bf16.msra.mxu0 %v627_v7 }
   0xe   : > { %s564_s8 = sshll.u32 %s782_s26, 3  ;;  %638 = vmatpush3.bf16.msra.mxu1 %v635_v15 }
   0xf   : > { %s220_s11 = scalar_lea.vmem %s775_s0, %s564_s8  ;;  %s226_s23 = scalar_lea.vmem %s780_s5, %s564_s8 }
  0x10   : > { %v228_v9 = vld [vmem:[%s220_s11] sm:$0xff]  ;;  %v229_v10 = vld [vmem:[%s220_s11 + $0x8] sm:$0xff]  ;;  %v230_v11 = vld [vmem:[%s220_s11 + $0x10] sm:$0xff] }
  0x11   : > { %603 = vmatprep.mubr.msk.f32.mxu0 %vm243_vm0, %v228_v9  ;;  %v231_v12 = vld [vmem:[%s220_s11 + $0x18] sm:$0xff] }
  0x12   : > { %604 = vmatmul.mubr.msk.f32.vlgmr.msra.gmra.mrb[0].mxu0 %vm243_vm0, %v229_v10 }
  0x13   : > { %606 = vmatprep.mubr.msk.f32.mxu0 %vm243_vm0, %v230_v11 }
  0x16   : > { %607 = vmatmul.mubr.msk.f32.gmra.mrb[2].mxu0 %vm243_vm0, %v231_v12 }
  0xe5   : > { %v605_v17 = vpop.f32.mrb[0].mxu0 }
  0xe6   : > { %v328_v18 = vadd.f32 %v605_v17, %v567_v16  ;;  %v322_v19 = vpop.f32.mrb[1].mxu0 }
  0xe7   : > { %v323_v20 = vadd.f32 %v567_v16, %v322_v19 }
  0xe8   : > { %v342_v23 = vmax.f32 %v328_v18, 0.0 }
  0xe9   : > { %v341_v21 = vmax.f32 %v323_v20, 0.0  ;;  %v608_v22 = vpop.f32.mrb[2].mxu0 }
  0xea   : > { %v338_v24 = vadd.f32 %v608_v22, %v567_v16  ;;  %v332_v25 = vpop.f32.mrb[3].mxu0 }
  0xeb   : > { %v333_v26 = vadd.f32 %v567_v16, %v332_v25  ;;  %617 = vmatprep.mubr.msk.f32.mxu1 %vm243_vm0, %v341_v21 }
  0xec   : > { %618 = vmatmul.mubr.msk.f32.vlgmr.msra.gmra.mrb[0].mxu1 %vm243_vm0, %v342_v23  ;;  %v344_v28 = vmax.f32 %v338_v24, 0.0 }
  0xed   : > { %v343_v27 = vmax.f32 %v333_v26, 0.0 }
  0xef   : > { %620 = vmatprep.mubr.msk.f32.mxu1 %vm243_vm0, %v343_v27 }
  0xf0   : > { %621 = vmatmul.mubr.msk.f32.gmra.mrb[2].mxu1 %vm243_vm0, %v344_v28 }
 0x1bf   : > { %v619_v30 = vpop.f32.mrb[0].mxu1 }
 0x1c0   : > { %v434_v31 = vpop.f32.mrb[1].mxu1  ;;  %v440_v33 = vadd.f32 %v619_v30, %v572_v29 }
 0x1c1   : > { %v435_v32 = vadd.f32 %v572_v29, %v434_v31 }
 0x1c2   : > { %v457_v40 = vsel %vm453_vm1, %v440_v33, -inf }
 0x1c3   : > { %v622_v34 = vpop.f32.mrb[2].mxu1  ;;  %v454_v35 = vsel %vm453_vm1, %v435_v32, -inf }
 0x1c4   : > { %v444_v36 = vpop.f32.mrb[3].mxu1  ;;  %455 = vmax.xlane.f32.xlu0 %v454_v35  ;;  %v450_v38 = vadd.f32 %v622_v34, %v572_v29 }
 0x1c5   : > { %v445_v37 = vadd.f32 %v572_v29, %v444_v36 }
 0x1c6   : > { %v463_v41 = vsel %vm453_vm1, %v450_v38, -inf }
 0x1c7   : > { %v460_v39 = vsel %vm453_vm1, %v445_v37, -inf }
 0x1c8   : > { %461 = vmax.xlane.f32.xlu1 %v460_v39  ;;  %458 = vmax.xlane.f32.xlu0 %v457_v40 }
 0x1cc   : > { %464 = vmax.xlane.f32.xlu1 %v463_v41 }
 0x251   : > { %v456_v42 = vpop.xlane.xlu0 %455 }
 0x252   : > { %v466_v43 = vsub.f32 %v435_v32, %v456_v42 }
 0x254   : > { %v470_v44 = vmul.f32 1.442695, %v466_v43 }
 0x255   : > { %v462_v45 = vpop.xlane.xlu1 %461  ;;  %v459_v46 = vpop.xlane.xlu0 %458 }
 0x256   : > { %647 = vpow2.f32 %v470_v44  ;;  %v468_v47 = vsub.f32 %v445_v37, %v462_v45  ;;  %v467_v48 = vsub.f32 %v440_v33, %v459_v46 }
 0x258   : > { %v474_v49 = vmul.f32 1.442695, %v468_v47  ;;  %v472_v50 = vmul.f32 1.442695, %v467_v48 }
 0x259   : > { %v465_v51 = vpop.xlane.xlu1 %464 }
 0x25a   : > { %649 = vpow2.f32 %v474_v49  ;;  %v469_v52 = vsub.f32 %v450_v38, %v465_v51 }
 0x25b   : > { %651 = vpow2.f32 %v472_v50 }
 0x25c   : > { %v476_v53 = vmul.f32 1.442695, %v469_v52 }
 0x25e   : > { %653 = vpow2.f32 %v476_v53 }
 0x260   : > { %v648_v54 = vpop.eup %647 }
 0x261   : > { %v478_v55 = vsel %vm453_vm1, %v648_v54, 0.0 }
 0x262   : > { %479 = vadd.xlane.f32.xlu0 %v478_v55 }
 0x264   : > { %v650_v56 = vpop.eup %649 }
 0x265   : > { %v652_v57 = vpop.eup %651  ;;  %v484_v58 = vsel %vm453_vm1, %v650_v56, 0.0 }
 0x266   : > { %485 = vadd.xlane.f32.xlu0 %v484_v58  ;;  %v481_v59 = vsel %vm453_vm1, %v652_v57, 0.0 }
 0x267   : > { %482 = vadd.xlane.f32.xlu1 %v481_v59 }
 0x268   : > { %v654_v60 = vpop.eup %653 }
 0x269   : > { %v487_v61 = vsel %vm453_vm1, %v654_v60, 0.0 }
 0x26b   : > { %488 = vadd.xlane.f32.xlu1 %v487_v61 }
 0x2ef   : > { %v480_v62 = vpop.xlane.xlu0 %479 }
 0x2f0   : > { %655 = vrcp.f32 %v480_v62 }
 0x2f3   : > { %v486_v63 = vpop.xlane.xlu0 %485 }
 0x2f4   : > { %v483_v0 = vpop.xlane.xlu1 %482  ;;  %657 = vrcp.f32 %v486_v63 }
 0x2f5   : > { %659 = vrcp.f32 %v483_v0 }
 0x2f8   : > { %v489_v1 = vpop.xlane.xlu1 %488 }
 0x2f9   : > { %661 = vrcp.f32 %v489_v1 }
 0x2fa   : > { %v656_v2 = vpop.eup %655 }
 0x2fb   : > { %v494_v3 = vmul.f32 %v656_v2, %v648_v54 }
 0x2fd   : > { %498 = vst.msk [vmem:[%s226_s23] sm:$0xff] %vm453_vm1, %v494_v3 }
 0x2fe   : > { %v658_v4 = vpop.eup %657 }
 0x2ff   : > { %v660_v5 = vpop.eup %659  ;;  %v496_v6 = vmul.f32 %v658_v4, %v650_v56 }
 0x300   : > { %v495_v7 = vmul.f32 %v660_v5, %v652_v57 }
 0x301   : > { %500 = vst.msk [vmem:[%s226_s23 + $0x10] sm:$0xff] %vm453_vm1, %v496_v6 }
 0x302   : > { %499 = vst.msk [vmem:[%s226_s23 + $0x8] sm:$0xff] %vm453_vm1, %v495_v7 }
 0x303   : > { %v662_v8 = vpop.eup %661 }
 0x304   : > { %v497_v9 = vmul.f32 %v662_v8, %v654_v60 }
 0x306   : > { %501 = vst.msk [vmem:[%s226_s23 + $0x18] sm:$0xff] %vm453_vm1, %v497_v9 }
 0x307 PF: > { %s15_s18 = sadd.s32 1, %s669_s18  }
 0x308   : > { %p12_p4 = scmp.ge.s32.totalorder %s15_s18, 4  }
 0x30a   :  { %14 = sbr.rel (!%p12_p4) target bundleno = 1 (0x1), region = 70 }

</bundles_post_ra>
